<compile_context>
chip_gen: v5e
topology: v5e:2x2
jax: 0.10.0
libtpu: 0.0.40
codegen_flags: <defaults>
</compile_context>

<pallas_src>
import jax
import jax.numpy as jnp
from jax.experimental import pallas as pl
from jax.experimental.pallas import tpu as pltpu

DIMS = [97, 256, 128, 64, 32, 6]
IN_PAD = 128   # layer-1 K dim padded so layer-1 LHS vregs are fully packed
OUT_PAD = 128  # lane-dense output slab (unmasked stores)


def mlp_kernel(x_ref,
               w1_ref, b1_ref, w2_ref, b2_ref, w3_ref, b3_ref,
               w4_ref, b4_ref, w5_ref, b5_ref,
               o_ref):
    # Activations travel in bf16 for the MXU; every dot accumulates in f32.
    h = x_ref[...]                                                        # (TB, 128) bf16

    h = jnp.dot(h, w1_ref[...], preferred_element_type=jnp.float32) + b1_ref[...]
    h = jnp.maximum(h, 0.0).astype(jnp.bfloat16)

    h = jnp.dot(h, w2_ref[...], preferred_element_type=jnp.float32) + b2_ref[...]
    h = jnp.maximum(h, 0.0).astype(jnp.bfloat16)

    h = jnp.dot(h, w3_ref[...], preferred_element_type=jnp.float32) + b3_ref[...]
    h = jnp.maximum(h, 0.0).astype(jnp.bfloat16)

    h = jnp.dot(h, w4_ref[...], preferred_element_type=jnp.float32) + b4_ref[...]
    h = jnp.maximum(h, 0.0).astype(jnp.bfloat16)

    h = jnp.dot(h, w5_ref[...], preferred_element_type=jnp.float32) + b5_ref[...]

    o_ref[...] = h.astype(o_ref.dtype)                                    # (TB, 128) f32


def _round_up(n, m):
    return ((n + m - 1) // m) * m


def mlp_forward(x, params, *, tile_b=512):
    """x: (B, 97) float32.  params: flat list [w1, b1, ..., w5, b5] (float32)."""
    B, in_dim = x.shape
    assert in_dim == DIMS[0]

    # Batch tile: sublane-aligned, capped at tile_b (<=512 keeps us far under
    # the v5e 16 MiB scoped-VMEM default even with double buffering).
    tile = min(tile_b, _round_up(B, 8))
    Bp = _round_up(B, tile)
    grid = (Bp // tile,)

    # Pad input to (Bp, 128) with zeros and cast to bf16 for the MXU.
    x_p = jnp.zeros((Bp, IN_PAD), jnp.float32).at[:B, :in_dim].set(x)
    x_p = x_p.astype(jnp.bfloat16)

    w1, b1, w2, b2, w3, b3, w4, b4, w5, b5 = params
    # Zero-pad layer-1 rows (K: 97->128) and layer-5 cols / bias (6->128).
    w1_p = jnp.zeros((IN_PAD, DIMS[1]), jnp.float32).at[:DIMS[0], :].set(w1)
    w5_p = jnp.zeros((DIMS[4], OUT_PAD), jnp.float32).at[:, :DIMS[5]].set(w5)
    b5_p = jnp.zeros((1, OUT_PAD), jnp.float32).at[:, :DIMS[5]].set(b5)

    weights = [w1_p.astype(jnp.bfloat16), b1,
               w2.astype(jnp.bfloat16), b2,
               w3.astype(jnp.bfloat16), b3,
               w4.astype(jnp.bfloat16), b4,
               w5_p.astype(jnp.bfloat16), b5_p]

    # Weights/biases: full-array blocks with a constant index_map -> fetched
    # once and kept VMEM-resident across all grid steps.
    def resident(a):
        return pl.BlockSpec(a.shape, lambda i: (0, 0))

    in_specs = ([pl.BlockSpec((tile, IN_PAD), lambda i: (i, 0))]
                + [resident(a) for a in weights])
    out_specs = pl.BlockSpec((tile, OUT_PAD), lambda i: (i, 0))

    flops = 2 * Bp * sum(DIMS[i] * DIMS[i + 1] for i in range(len(DIMS) - 1))
    weight_bytes = sum(int(a.size) * a.dtype.itemsize for a in weights)
    bytes_accessed = int(x_p.size) * 2 + Bp * OUT_PAD * 4 + weight_bytes

    out_padded = pl.pallas_call(
        mlp_kernel,
        out_shape=jax.ShapeDtypeStruct((Bp, OUT_PAD), jnp.float32),
        grid=grid,
        in_specs=in_specs,
        out_specs=out_specs,
        compiler_params=pltpu.CompilerParams(
            dimension_semantics=("parallel",)),
        cost_estimate=pl.CostEstimate(
            flops=flops, transcendentals=0, bytes_accessed=bytes_accessed),
    )(x_p, *weights)

    return out_padded[:B, :DIMS[5]]


def init_params(key):
    """Deterministic init mirroring nn.Linear default (uniform +-1/sqrt(fan_in))."""
    params = []
    for i in range(len(DIMS) - 1):
        fan_in, fan_out = DIMS[i], DIMS[i + 1]
        key, kw, kb = jax.random.split(key, 3)
        bound = 1.0 / jnp.sqrt(jnp.float32(fan_in))
        w = jax.random.uniform(kw, (fan_in, fan_out), jnp.float32, -bound, bound)
        b = jax.random.uniform(kb, (1, fan_out), jnp.float32, -bound, bound)
        params += [w, b]
    return params


def mlp_reference(x, params):
    h = x
    for i in range(0, len(params), 2):
        w, b = params[i], params[i + 1]
        h = h @ w + b
        if i < len(params) - 2:
            h = jnp.maximum(h, 0.0)
    return h


if __name__ == "__main__":
    key = jax.random.PRNGKey(0)
    key, kx = jax.random.split(key)
    params = init_params(key)

    # Small batch (single grid step).
    B = 8
    x = jax.random.normal(kx, (B, 97), jnp.float32)
    out = jax.block_until_ready(mlp_forward(x, params))
    ref = mlp_reference(x, params)
    assert out.shape == (B, 6), out.shape
    # bf16 weights/activations with f32 accumulation -> loose tolerance vs f32 ref.
    assert jnp.allclose(out, ref, atol=3e-2, rtol=3e-2), float(jnp.max(jnp.abs(out - ref)))

    # Ragged batch exercising grid > 1 and tail padding.
    key, kx2 = jax.random.split(key)
    B2 = 130
    x2 = jax.random.normal(kx2, (B2, 97), jnp.float32)
    out2 = jax.block_until_ready(mlp_forward(x2, params, tile_b=64))
    ref2 = mlp_reference(x2, params)
    assert out2.shape == (B2, 6), out2.shape
    assert jnp.allclose(out2, ref2, atol=3e-2, rtol=3e-2), float(jnp.max(jnp.abs(out2 - ref2)))

    print("KERNEL_OK")
</pallas_src>

<mosaic_0001>
module attributes {stable_mosaic.version = 11 : i64} {
  func.func @mlp_kernel(%arg0: i32, %arg1: memref<8x128xbf16, #tpu.memory_space<vmem>>, %arg2: memref<128x256xbf16, #tpu.memory_space<vmem>>, %arg3: memref<1x256xf32, #tpu.memory_space<vmem>>, %arg4: memref<256x128xbf16, #tpu.memory_space<vmem>>, %arg5: memref<1x128xf32, #tpu.memory_space<vmem>>, %arg6: memref<128x64xbf16, #tpu.memory_space<vmem>>, %arg7: memref<1x64xf32, #tpu.memory_space<vmem>>, %arg8: memref<64x32xbf16, #tpu.memory_space<vmem>>, %arg9: memref<1x32xf32, #tpu.memory_space<vmem>>, %arg10: memref<32x128xbf16, #tpu.memory_space<vmem>>, %arg11: memref<1x128xf32, #tpu.memory_space<vmem>>, %arg12: memref<8x128xf32, #tpu.memory_space<vmem>>) attributes {dimension_semantics = [#tpu.dimension_semantics<parallel>], iteration_bounds = array<i64: 1>, scalar_prefetch = 0 : i64, scratch_operands = 0 : i64, tpu.core_type = #tpu.core_type<tc>, window_params = [{transform_indices = @transform_0, window_bounds = array<i64: 8, 128>}, {pipeline_mode = #tpu.pipeline_mode<synchronous>, transform_indices = @transform_1, window_bounds = array<i64: 128, 256>}, {pipeline_mode = #tpu.pipeline_mode<synchronous>, transform_indices = @transform_2, window_bounds = array<i64: 1, 256>}, {pipeline_mode = #tpu.pipeline_mode<synchronous>, transform_indices = @transform_3, window_bounds = array<i64: 256, 128>}, {pipeline_mode = #tpu.pipeline_mode<synchronous>, transform_indices = @transform_4, window_bounds = array<i64: 1, 128>}, {pipeline_mode = #tpu.pipeline_mode<synchronous>, transform_indices = @transform_5, window_bounds = array<i64: 128, 64>}, {pipeline_mode = #tpu.pipeline_mode<synchronous>, transform_indices = @transform_6, window_bounds = array<i64: 1, 64>}, {pipeline_mode = #tpu.pipeline_mode<synchronous>, transform_indices = @transform_7, window_bounds = array<i64: 64, 32>}, {pipeline_mode = #tpu.pipeline_mode<synchronous>, transform_indices = @transform_8, window_bounds = array<i64: 1, 32>}, {pipeline_mode = #tpu.pipeline_mode<synchronous>, transform_indices = @transform_9, window_bounds = array<i64: 32, 128>}, {pipeline_mode = #tpu.pipeline_mode<synchronous>, transform_indices = @transform_10, window_bounds = array<i64: 1, 128>}, {transform_indices = @transform_11, window_bounds = array<i64: 8, 128>}]} {
    %c0 = arith.constant 0 : index
    %c0_0 = arith.constant 0 : index
    %0 = vector.load %arg1[%c0, %c0_0] : memref<8x128xbf16, #tpu.memory_space<vmem>>, vector<8x128xbf16>
    %c0_1 = arith.constant 0 : index
    %c0_2 = arith.constant 0 : index
    %1 = vector.load %arg2[%c0_1, %c0_2] : memref<128x256xbf16, #tpu.memory_space<vmem>>, vector<128x256xbf16>
    %cst = arith.constant dense<0.000000e+00> : vector<8x256xf32>
    %2 = tpu.matmul %0, %1, %cst {dimension_numbers = #tpu.dot_dimension_numbers<[1], [0], [0], [1], [0, 0, 1, 1], [], []>} : vector<8x128xbf16>, vector<128x256xbf16>, vector<8x256xf32> -> vector<8x256xf32>
    %c0_3 = arith.constant 0 : index
    %c0_4 = arith.constant 0 : index
    %3 = vector.load %arg3[%c0_3, %c0_4] : memref<1x256xf32, #tpu.memory_space<vmem>>, vector<1x256xf32>
    %4 = vector.broadcast %3 : vector<1x256xf32> to vector<8x256xf32>
    %5 = arith.addf %2, %4 : vector<8x256xf32>
    %cst_5 = arith.constant 0.000000e+00 : f32
    %6 = vector.broadcast %cst_5 : f32 to vector<8x256xf32>
    %7 = arith.maximumf %5, %6 : vector<8x256xf32>
    %8 = arith.truncf %7 : vector<8x256xf32> to vector<8x256xbf16>
    %c0_6 = arith.constant 0 : index
    %c0_7 = arith.constant 0 : index
    %9 = vector.load %arg4[%c0_6, %c0_7] : memref<256x128xbf16, #tpu.memory_space<vmem>>, vector<256x128xbf16>
    %cst_8 = arith.constant dense<0.000000e+00> : vector<8x128xf32>
    %10 = tpu.matmul %8, %9, %cst_8 {dimension_numbers = #tpu.dot_dimension_numbers<[1], [0], [0], [1], [0, 0, 1, 1], [], []>} : vector<8x256xbf16>, vector<256x128xbf16>, vector<8x128xf32> -> vector<8x128xf32>
    %c0_9 = arith.constant 0 : index
    %c0_10 = arith.constant 0 : index
    %11 = vector.load %arg5[%c0_9, %c0_10] : memref<1x128xf32, #tpu.memory_space<vmem>>, vector<1x128xf32>
    %12 = vector.broadcast %11 : vector<1x128xf32> to vector<8x128xf32>
    %13 = arith.addf %10, %12 : vector<8x128xf32>
    %cst_11 = arith.constant 0.000000e+00 : f32
    %14 = vector.broadcast %cst_11 : f32 to vector<8x128xf32>
    %15 = arith.maximumf %13, %14 : vector<8x128xf32>
    %16 = arith.truncf %15 : vector<8x128xf32> to vector<8x128xbf16>
    %c0_12 = arith.constant 0 : index
    %c0_13 = arith.constant 0 : index
    %17 = vector.load %arg6[%c0_12, %c0_13] : memref<128x64xbf16, #tpu.memory_space<vmem>>, vector<128x64xbf16>
    %cst_14 = arith.constant dense<0.000000e+00> : vector<8x64xf32>
    %18 = tpu.matmul %16, %17, %cst_14 {dimension_numbers = #tpu.dot_dimension_numbers<[1], [0], [0], [1], [0, 0, 1, 1], [], []>} : vector<8x128xbf16>, vector<128x64xbf16>, vector<8x64xf32> -> vector<8x64xf32>
    %c0_15 = arith.constant 0 : index
    %c0_16 = arith.constant 0 : index
    %19 = vector.load %arg7[%c0_15, %c0_16] : memref<1x64xf32, #tpu.memory_space<vmem>>, vector<1x64xf32>
    %20 = vector.broadcast %19 : vector<1x64xf32> to vector<8x64xf32>
    %21 = arith.addf %18, %20 : vector<8x64xf32>
    %cst_17 = arith.constant 0.000000e+00 : f32
    %22 = vector.broadcast %cst_17 : f32 to vector<8x64xf32>
    %23 = arith.maximumf %21, %22 : vector<8x64xf32>
    %24 = arith.truncf %23 : vector<8x64xf32> to vector<8x64xbf16>
    %c0_18 = arith.constant 0 : index
    %c0_19 = arith.constant 0 : index
    %25 = vector.load %arg8[%c0_18, %c0_19] : memref<64x32xbf16, #tpu.memory_space<vmem>>, vector<64x32xbf16>
    %cst_20 = arith.constant dense<0.000000e+00> : vector<8x32xf32>
    %26 = tpu.matmul %24, %25, %cst_20 {dimension_numbers = #tpu.dot_dimension_numbers<[1], [0], [0], [1], [0, 0, 1, 1], [], []>} : vector<8x64xbf16>, vector<64x32xbf16>, vector<8x32xf32> -> vector<8x32xf32>
    %c0_21 = arith.constant 0 : index
    %c0_22 = arith.constant 0 : index
    %27 = vector.load %arg9[%c0_21, %c0_22] : memref<1x32xf32, #tpu.memory_space<vmem>>, vector<1x32xf32>
    %28 = vector.broadcast %27 : vector<1x32xf32> to vector<8x32xf32>
    %29 = arith.addf %26, %28 : vector<8x32xf32>
    %cst_23 = arith.constant 0.000000e+00 : f32
    %30 = vector.broadcast %cst_23 : f32 to vector<8x32xf32>
    %31 = arith.maximumf %29, %30 : vector<8x32xf32>
    %32 = arith.truncf %31 : vector<8x32xf32> to vector<8x32xbf16>
    %c0_24 = arith.constant 0 : index
    %c0_25 = arith.constant 0 : index
    %33 = vector.load %arg10[%c0_24, %c0_25] : memref<32x128xbf16, #tpu.memory_space<vmem>>, vector<32x128xbf16>
    %cst_26 = arith.constant dense<0.000000e+00> : vector<8x128xf32>
    %34 = tpu.matmul %32, %33, %cst_26 {dimension_numbers = #tpu.dot_dimension_numbers<[1], [0], [0], [1], [0, 0, 1, 1], [], []>} : vector<8x32xbf16>, vector<32x128xbf16>, vector<8x128xf32> -> vector<8x128xf32>
    %c0_27 = arith.constant 0 : index
    %c0_28 = arith.constant 0 : index
    %35 = vector.load %arg11[%c0_27, %c0_28] : memref<1x128xf32, #tpu.memory_space<vmem>>, vector<1x128xf32>
    %36 = vector.broadcast %35 : vector<1x128xf32> to vector<8x128xf32>
    %37 = arith.addf %34, %36 : vector<8x128xf32>
    %c0_29 = arith.constant 0 : index
    %c0_30 = arith.constant 0 : index
    %38 = vector.load %arg12[%c0_29, %c0_30] : memref<8x128xf32, #tpu.memory_space<vmem>>, vector<8x128xf32>
    tpu.vector_store %arg12[%c0_29, %c0_30], %37 {strides = array<i32>} : memref<8x128xf32, #tpu.memory_space<vmem>>, vector<8x128xf32>,
    return
  }
  func.func @transform_0(%arg0: i32) -> (i32, i32) {
    %c0_i32 = arith.constant 0 : i32
    %c0_i32_0 = arith.constant 0 : i32
    return %arg0, %c0_i32 : i32, i32
  }
  func.func @transform_1(%arg0: i32) -> (i32, i32) {
    %c0_i32 = arith.constant 0 : i32
    %c0_i32_0 = arith.constant 0 : i32
    %c0_i32_1 = arith.constant 0 : i32
    return %c0_i32, %c0_i32_0 : i32, i32
  }
  func.func @transform_2(%arg0: i32) -> (i32, i32) {
    %c0_i32 = arith.constant 0 : i32
    %c0_i32_0 = arith.constant 0 : i32
    %c0_i32_1 = arith.constant 0 : i32
    return %c0_i32, %c0_i32_0 : i32, i32
  }
  func.func @transform_3(%arg0: i32) -> (i32, i32) {
    %c0_i32 = arith.constant 0 : i32
    %c0_i32_0 = arith.constant 0 : i32
    %c0_i32_1 = arith.constant 0 : i32
    return %c0_i32, %c0_i32_0 : i32, i32
  }
  func.func @transform_4(%arg0: i32) -> (i32, i32) {
    %c0_i32 = arith.constant 0 : i32
    %c0_i32_0 = arith.constant 0 : i32
    %c0_i32_1 = arith.constant 0 : i32
    return %c0_i32, %c0_i32_0 : i32, i32
  }
  func.func @transform_5(%arg0: i32) -> (i32, i32) {
    %c0_i32 = arith.constant 0 : i32
    %c0_i32_0 = arith.constant 0 : i32
    %c0_i32_1 = arith.constant 0 : i32
    return %c0_i32, %c0_i32_0 : i32, i32
  }
  func.func @transform_6(%arg0: i32) -> (i32, i32) {
    %c0_i32 = arith.constant 0 : i32
    %c0_i32_0 = arith.constant 0 : i32
    %c0_i32_1 = arith.constant 0 : i32
    return %c0_i32, %c0_i32_0 : i32, i32
  }
  func.func @transform_7(%arg0: i32) -> (i32, i32) {
    %c0_i32 = arith.constant 0 : i32
    %c0_i32_0 = arith.constant 0 : i32
    %c0_i32_1 = arith.constant 0 : i32
    return %c0_i32, %c0_i32_0 : i32, i32
  }
  func.func @transform_8(%arg0: i32) -> (i32, i32) {
    %c0_i32 = arith.constant 0 : i32
    %c0_i32_0 = arith.constant 0 : i32
    %c0_i32_1 = arith.constant 0 : i32
    return %c0_i32, %c0_i32_0 : i32, i32
  }
  func.func @transform_9(%arg0: i32) -> (i32, i32) {
    %c0_i32 = arith.constant 0 : i32
    %c0_i32_0 = arith.constant 0 : i32
    %c0_i32_1 = arith.constant 0 : i32
    return %c0_i32, %c0_i32_0 : i32, i32
  }
  func.func @transform_10(%arg0: i32) -> (i32, i32) {
    %c0_i32 = arith.constant 0 : i32
    %c0_i32_0 = arith.constant 0 : i32
    %c0_i32_1 = arith.constant 0 : i32
    return %c0_i32, %c0_i32_0 : i32, i32
  }
  func.func @transform_11(%arg0: i32) -> (i32, i32) {
    %c0_i32 = arith.constant 0 : i32
    %c0_i32_0 = arith.constant 0 : i32
    return %arg0, %c0_i32 : i32, i32
  }
}

</mosaic_0001>

<bundles_post_ra>
// kernel: tpu_custom_call.1
= control target key start
LH: loop header
LB: loop body
LE: loop exit
PB: predicated region body
PF: predicated region fallthrough
CT: control target
= control target key end

     0   :  { %16 = vsyncpa [#allocation3], 0  ;;  %s1142_s0 = inlined_call_operand.hbm [shape: bf16[8,128], index: 0, kind: input, shape index: {}]   ;;  %s1143_s1 = inlined_call_operand.vmem [shape: bf16[128,256], index: 1, kind: input, shape index: {}]   ;;  %s1144_s2 = inlined_call_operand.hbm [shape: f32[1,256], index: 2, kind: input, shape index: {}]   ;;  %s1145_s3 = inlined_call_operand.hbm [shape: bf16[256,128], index: 3, kind: input, shape index: {}]   ;;  %s1146_s4 = inlined_call_operand.vmem [shape: f32[1,128], index: 4, kind: input, shape index: {}]   ;;  %s1147_s5 = inlined_call_operand.vmem [shape: bf16[128,64], index: 5, kind: input, shape index: {}]   ;;  %s1148_s6 = inlined_call_operand.vmem [shape: f32[1,64], index: 6, kind: input, shape index: {}]   ;;  %s1149_s7 = inlined_call_operand.vmem [shape: bf16[64,32], index: 7, kind: input, shape index: {}]   ;;  %s1150_s8 = inlined_call_operand.vmem [shape: f32[1,32], index: 8, kind: input, shape index: {}]   ;;  %s1151_s9 = inlined_call_operand.vmem [shape: bf16[32,128], index: 9, kind: input, shape index: {}]   ;;  %s1152_s10 = inlined_call_operand.vmem [shape: f32[1,128], index: 10, kind: input, shape index: {}]   ;;  %s1153_s11 = inlined_call_operand.hbm [shape: f32[8,128], index: 11, kind: output, shape index: {}]  }
   0x1   :  { %17 = vsyncpa [#allocation6], 0  ;;  %s37_s19 = sshll.u32 %s1144_s2, 4  ;;  %s38_s19 = int_to_ptr.hbm [resolvable:$true] %s37_s19 }
   0x2   :  { %18 = vsyncpa [#allocation4], 0  ;;  %s914_s20 = smov [#allocation5]   ;;  %s24_s24 = sshll.u32 %s1142_s0, 4  ;;  %s25_s24 = int_to_ptr.hbm [resolvable:$true] %s24_s24 }
   0x3   :  { %s39_s21 = sshll.u32 %s914_s20, 4  ;;  %s915_s25 = smov [#allocation2]   ;;  %s40_s21 = int_to_ptr.vmem [resolvable:$true] %s39_s21 }
   0x4   :  { %42 = dma.hbm_to_vmem [thread:$0]  %s38_s19, 32, %s40_s21, [#allocation6]  }
   0x5   :  { %s26_s26 = sshll.u32 %s915_s25, 4  ;;  %s47_s29 = sshll.u32 %s1145_s3, 4  ;;  %s27_s26 = int_to_ptr.vmem [resolvable:$true] %s26_s26  ;;  %s48_s29 = int_to_ptr.hbm [resolvable:$true] %s47_s29 }
   0x6   :  { %29 = dma.hbm_to_vmem [thread:$0]  %s25_s24, 64, %s27_s26, [#allocation3]  }
   0x7   :  { %s916_s2 = smov [#allocation7]   ;;  %s917_s12 = smov 64  }
   0x8   :  { %s49_s30 = sshll.u32 %s916_s2, 4  ;;  %s918_s13 = smov 4   ;;  %s50_s30 = int_to_ptr.vmem [resolvable:$true] %s49_s30 }
   0x9   :  { %55 = dma.hbm_to_vmem [thread:$0]  %s48_s29, 2048, %s50_s30, [#allocation6], %s917_s12, %s917_s12, %s918_s13  }
   0xa   :  { %908 = dma.done.wait [#allocation3], 64  }
   0xb   :  { %909 = vsyncadd [#allocation3], 4294967232 }
   0xc   :  { %910 = dma.done.wait [#allocation6], 2080  }
   0xd   :  { %911 = vsyncadd [#allocation6], 4294965216  ;;  %v628_v0 = vld [vmem:[%s1143_s1 + $0x70] sm:$0xf]  ;;  %v771_v1 = vld [vmem:[%s1143_s1 + $0x74] sm:$0xf0] }
   0xe   :  { %v770_v2 = vld [vmem:[%s1143_s1 + $0x74] sm:$0xf]  ;;  %v629_v3 = vor.u32 %v771_v1, %v628_v0  ;;  %v630_v4 = vld [vmem:[%s1143_s1 + $0x78] sm:$0xf0]  ;;  %v620_v5 = vld [vmem:[%s1143_s1 + $0x60] sm:$0xf] }
   0xf   :  { %v769_v6 = vld [vmem:[%s1143_s1 + $0x64] sm:$0xf0]  ;;  %v633_v7 = vor.u32 %v770_v2, %v630_v4  ;;  %v768_v8 = vld [vmem:[%s1143_s1 + $0x64] sm:$0xf]  ;;  %v622_v9 = vld [vmem:[%s1143_s1 + $0x68] sm:$0xf0] }
  0x10   :  { %186 = vmatpush.bf16.msra.mxu0 %v629_v3  ;;  %v621_v10 = vor.u32 %v769_v6, %v620_v5  ;;  %v625_v11 = vor.u32 %v768_v8, %v622_v9  ;;  %v612_v12 = vld [vmem:[%s1143_s1 + $0x50] sm:$0xf]  ;;  %v767_v13 = vld [vmem:[%s1143_s1 + $0x54] sm:$0xf0]  ;;  %v766_v14 = vld [vmem:[%s1143_s1 + $0x54] sm:$0xf] }
  0x11   :  { %199 = vmatpush.bf16.msra.mxu1 %v633_v7  ;;  %v614_v15 = vld [vmem:[%s1143_s1 + $0x58] sm:$0xf0]  ;;  %v613_v16 = vor.u32 %v767_v13, %v612_v12  ;;  %v604_v18 = vld [vmem:[%s1143_s1 + $0x40] sm:$0xf]  ;;  %v765_v19 = vld [vmem:[%s1143_s1 + $0x44] sm:$0xf0] }
  0x12   :  { %v617_v17 = vor.u32 %v766_v14, %v614_v15  ;;  %v764_v20 = vld [vmem:[%s1143_s1 + $0x44] sm:$0xf]  ;;  %v606_v21 = vld [vmem:[%s1143_s1 + $0x48] sm:$0xf0]  ;;  %v605_v22 = vor.u32 %v765_v19, %v604_v18  ;;  %v596_v26 = vld [vmem:[%s1143_s1 + $0x30] sm:$0xf] }
  0x13   :  { %v779_v23 = vld [vmem:[#allocation7 + $0x38] sm:$0xff]  ;;  %v609_v25 = vor.u32 %v764_v20, %v606_v21  ;;  %v763_v27 = vld [vmem:[%s1143_s1 + $0x34] sm:$0xf0]  ;;  %v762_v28 = vld [vmem:[%s1143_s1 + $0x34] sm:$0xf]  ;;  %vm495_vm0 = vcmask 523264  }
  0x14   :  { %187 = vmatpush.bf16.msra.mxu0 %v621_v10  ;;  %v787_v24 = vld [vmem:[#allocation7 + $0x78] sm:$0xff]  ;;  %348 = vmatpush.bf16.msra.mxu2 %v779_v23  ;;  %v778_v30 = vld [vmem:[#allocation7 + $0x30] sm:$0xff]  ;;  %v597_v33 = vor.u32 %v763_v27, %v596_v26  ;;  %v761_v34 = vld [vmem:[%s1143_s1 + $0x24] sm:$0xf0]  ;;  %vm534_vm1 = vcmask 261120   ;;  %s919_s17 = smov [#allocation8]  }
  0x15   :  { %200 = vmatpush.bf16.msra.mxu1 %v625_v11  ;;  %v598_v29 = vld [vmem:[%s1143_s1 + $0x38] sm:$0xf0]  ;;  %361 = vmatpush.bf16.msra.mxu3 %v787_v24  ;;  %v588_v32 = vld [vmem:[%s1143_s1 + $0x20] sm:$0xf]  ;;  %v760_v36 = vld [vmem:[%s1143_s1 + $0x24] sm:$0xf] }
  0x16   :  { %v786_v31 = vld [vmem:[#allocation7 + $0x70] sm:$0xff]  ;;  %v601_v35 = vor.u32 %v762_v28, %v598_v29  ;;  %v590_v37 = vld [vmem:[%s1143_s1 + $0x28] sm:$0xf0]  ;;  %v589_v40 = vor.u32 %v761_v34, %v588_v32  ;;  %v580_v42 = vld [vmem:[%s1143_s1 + $0x10] sm:$0xf]  ;;  %s557_s18 = sshll.u32 %s919_s17, 4  ;;  %s558_s18 = int_to_ptr.vmem [resolvable:$true] %s557_s18 }
  0x17   :  { %v777_v38 = vld [vmem:[#allocation7 + $0x28] sm:$0xff]  ;;  %v593_v41 = vor.u32 %v760_v36, %v590_v37  ;;  %v759_v43 = vld [vmem:[%s1143_s1 + $0x14] sm:$0xf0]  ;;  %v582_v45 = vld [vmem:[%s1143_s1 + $0x18] sm:$0xf0]  ;;  %s559_s21 = sshll.u32 %s1153_s11, 4  ;;  %s560_s21 = int_to_ptr.hbm [resolvable:$true] %s559_s21 }
  0x18   :  { %188 = vmatpush.bf16.msra.mxu0 %v613_v16  ;;  %349 = vmatpush.bf16.msra.mxu2 %v778_v30  ;;  %v785_v39 = vld [vmem:[#allocation7 + $0x68] sm:$0xff]  ;;  %v776_v46 = vld [vmem:[#allocation7 + $0x20] sm:$0xff]  ;;  %v581_v48 = vor.u32 %v759_v43, %v580_v42  ;;  %v572_v50 = vld [vmem:[%s1143_s1] sm:$0xf] }
  0x19   :  { %201 = vmatpush.bf16.msra.mxu1 %v617_v17  ;;  %362 = vmatpush.bf16.msra.mxu3 %v786_v31  ;;  %v758_v44 = vld [vmem:[%s1143_s1 + $0x14] sm:$0xf]  ;;  %v784_v47 = vld [vmem:[#allocation7 + $0x60] sm:$0xff]  ;;  %v775_v54 = vld [vmem:[#allocation7 + $0x18] sm:$0xff] }
  0x1a   :  { %v585_v49 = vor.u32 %v758_v44, %v582_v45  ;;  %v757_v51 = vld [vmem:[%s1143_s1 + $0x4] sm:$0xf0]  ;;  %v756_v52 = vld [vmem:[%s1143_s1 + $0x4] sm:$0xf]  ;;  %v574_v53 = vld [vmem:[%s1143_s1 + $0x8] sm:$0xf0] }
  0x1b   :  { %v783_v55 = vld [vmem:[#allocation7 + $0x58] sm:$0xff]  ;;  %v573_v56 = vor.u32 %v757_v51, %v572_v50  ;;  %v577_v57 = vor.u32 %v756_v52, %v574_v53  ;;  %v774_v58 = vld [vmem:[#allocation7 + $0x10] sm:$0xff]  ;;  %v773_v61 = vld [vmem:[#allocation7 + $0x8] sm:$0xff] }
  0x1c   :  { %189 = vmatpush.bf16.msra.mxu0 %v605_v22  ;;  %350 = vmatpush.bf16.msra.mxu2 %v777_v38  ;;  %v782_v59 = vld [vmem:[#allocation7 + $0x50] sm:$0xff]  ;;  %v83_v60 = vld [vmem:[#allocation2] sm:$0xf]  ;;  %v781_v62 = vld [vmem:[#allocation7 + $0x48] sm:$0xff] }
  0x1d   :  { %202 = vmatpush.bf16.msra.mxu1 %v609_v25  ;;  %363 = vmatpush.bf16.msra.mxu3 %v785_v39  ;;  %v772_v63 = vld [vmem:[#allocation7] sm:$0xff]  ;;  %v795_v1 = vld [vmem:[%s1147_s5 + $0x38] sm:$0xff]  ;;  %v794_v2 = vld [vmem:[%s1147_s5 + $0x30] sm:$0xff] }
  0x1e   :  { %v780_v0 = vld [vmem:[#allocation7 + $0x40] sm:$0xff]  ;;  %v791_v5 = vld [vmem:[%s1147_s5 + $0x18] sm:$0xff]  ;;  %v100_v6 = vld [vmem:[#allocation5] sm:$0x3] }
  0x1f   :  { %v793_v3 = vld [vmem:[%s1147_s5 + $0x28] sm:$0xff]  ;;  %v792_v4 = vld [vmem:[%s1147_s5 + $0x20] sm:$0xff]  ;;  %v790_v7 = vld [vmem:[%s1147_s5 + $0x10] sm:$0xff]  ;;  %v102_v8 = vperm.slane %v100_v6, 0  ;;  %v103_v9 = vperm.slane %v100_v6, 1 }
  0x20   :  { %190 = vmatpush.bf16.msra.mxu0 %v597_v33  ;;  %351 = vmatpush.bf16.msra.mxu2 %v776_v46  ;;  %v789_v20 = vld [vmem:[%s1147_s5 + $0x8] sm:$0xff]  ;;  %v788_v21 = vld [vmem:[%s1147_s5] sm:$0xff]  ;;  %v799_v22 = vld [vmem:[%s1149_s7 + $0x18] sm:$0xff] }
  0x21   :  { %203 = vmatpush.bf16.msra.mxu1 %v601_v35  ;;  %364 = vmatpush.bf16.msra.mxu3 %v784_v47  ;;  %v798_v23 = vld [vmem:[%s1149_s7 + $0x10] sm:$0xff]  ;;  %v797_v24 = vld [vmem:[%s1149_s7 + $0x8] sm:$0xff]  ;;  %v808_v25 = vld [vmem:[%s1146_s4] ss:$0 sm:$0xff] }
  0x22   :  { %v796_v34 = vld [vmem:[%s1149_s7] sm:$0xff]  ;;  %v801_v35 = vld [vmem:[%s1151_s9 + $0x8] sm:$0xff] }
  0x23   :  { %v800_v36 = vld [vmem:[%s1151_s9] sm:$0xff] }
  0x24   :  { %191 = vmatpush.bf16.msra.mxu0 %v589_v40  ;;  %352 = vmatpush.bf16.msra.mxu2 %v775_v54  ;;  %v809_v37 = vld [vmem:[%s1148_s6] ss:$0 sm:$0xff] }
  0x25   :  { %204 = vmatpush.bf16.msra.mxu1 %v593_v41  ;;  %365 = vmatpush.bf16.msra.mxu3 %v783_v55  ;;  %v810_v43 = vld [vmem:[%s1150_s8] ss:$0 sm:$0xff] }
  0x28   :  { %192 = vmatpush.bf16.msra.mxu0 %v581_v48  ;;  %353 = vmatpush.bf16.msra.mxu2 %v774_v58 }
  0x29   :  { %205 = vmatpush.bf16.msra.mxu1 %v585_v49  ;;  %366 = vmatpush.bf16.msra.mxu3 %v782_v59  ;;  %v811_v49 = vld [vmem:[%s1152_s10] ss:$0 sm:$0xff] }
  0x2c   :  { %193 = vmatpush.bf16.msra.mxu0 %v573_v56  ;;  %354 = vmatpush.bf16.msra.mxu2 %v773_v61 }
  0x2d   :  { %206 = vmatpush.bf16.msra.mxu1 %v577_v57  ;;  %367 = vmatpush.bf16.msra.mxu3 %v781_v62 }
  0x2f   :  { %194 = vmatmul.bf16.vlgmr.msra.gmra.mxu0 %v83_v60 }
  0x30   :  { %207 = vmatmul.bf16.vlgmr.msra.gmra.mxu1 %v83_v60  ;;  %355 = vmatpush.bf16.msra.mxu2 %v772_v63 }
  0x31   :  { %368 = vmatpush.bf16.msra.mxu3 %v780_v0  ;;  %444 = vmatpush.bf16.msrb.mxu0 %v795_v1 }
  0x32   :  { %503 = vmatpush.bf16.msrb.mxu1 %v799_v22 }
  0x34   :  { %544 = vmatpush.bf16.msrb.mxu2 %v801_v35 }
  0x35   :  { %445 = vmatpush.bf16.msrb.mxu0 %v794_v2 }
  0x36   :  { %504 = vmatpush.bf16.msrb.mxu1 %v798_v23 }
  0x38   :  { %545 = vmatpush.bf16.msrb.mxu2 %v800_v36 }
  0x39   :  { %446 = vmatpush.bf16.msrb.mxu0 %v793_v3 }
  0x3a   :  { %505 = vmatpush.bf16.msrb.mxu1 %v797_v24 }
  0x3d   :  { %447 = vmatpush.bf16.msrb.mxu0 %v792_v4 }
  0x3e   :  { %506 = vmatpush.bf16.msrb.mxu1 %v796_v34 }
  0x41   :  { %448 = vmatpush.bf16.msrb.mxu0 %v791_v5 }
  0x45   :  { %449 = vmatpush.bf16.msrb.mxu0 %v790_v7 }
  0x49   :  { %450 = vmatpush.bf16.msrb.mxu0 %v789_v20 }
  0x4d   :  { %451 = vmatpush.bf16.msrb.mxu0 %v788_v21 }
  0xac   :  { %v195_v10 = vpop.f32.mrf.mxu0 }
  0xad   :  { %v196_v11 = vadd.f32 %v195_v10, %v102_v8  ;;  %v208_v12 = vpop.f32.mrf.mxu1 }
  0xae   :  { %v209_v13 = vadd.f32 %v208_v12, %v103_v9 }
  0xaf   :  { %v212_v14 = vmax.f32 %v196_v11, 0.0 }
  0xb0   :  { %v213_v15 = vmax.f32 %v209_v13, 0.0 }
  0xb1   :  { %v214_v16 = vpack.c.bf16 %v212_v14, %v212_v14 }
  0xb2   :  { %v215_v17 = vpack.c.bf16 %v213_v15, %v213_v15 }
  0xb3   :  { %356 = vmatmul.bf16.vlgmr.msra.gmra.mxu2 %v214_v16 }
  0xb4   :  { %369 = vmatmul.bf16.vlgmr.msra.gmra.mxu3 %v215_v17  ;;  %v197_v18 = vpop.f32.mrf.mxu0 }
  0xb5   :  { %v210_v19 = vpop.f32.mrf.mxu1 }
 0x136   :  { %v357_v26 = vpop.f32.mrf.mxu2 }
 0x137   :  { %v358_v27 = vadd.f32 %v808_v25, %v357_v26  ;;  %v370_v28 = vpop.f32.mrf.mxu3 }
 0x139   :  { %v371_v29 = vadd.f32 %v370_v28, %v358_v27 }
 0x13b   :  { %v374_v30 = vmax.f32 %v371_v29, 0.0 }
 0x13d   :  { %v375_v31 = vpack.c.bf16 %v374_v30, %v374_v30 }
 0x13e   :  { %v359_v32 = vpop.f32.mrf.mxu2 }
 0x13f   :  { %v372_v33 = vpop.f32.mrf.mxu3  ;;  %452 = vmatmul.bf16.vlgmr.msrb.gmra.mxu0 %v375_v31 }
 0x1bc   :  { %v453_v38 = vpop.f32.mrf.mxu0 }
 0x1bd   :  { %v454_v39 = vadd.f32 %v809_v37, %v453_v38 }
 0x1bf   :  { %v457_v40 = vmax.f32 %v454_v39, 0.0 }
 0x1c1   :  { %v458_v41 = vpack.c.bf16 %v457_v40, %v457_v40 }
 0x1c3   :  { %746 = vmatmul.msk.bf16.vlgmr.msrb.gmra.mxu1 %vm495_vm0, %v458_v41 }
 0x1c4   :  { %v455_v42 = vpop.f32.mrf.mxu0 }
 0x240   :  { %v508_v44 = vpop.f32.mrf.mxu1 }
 0x241   :  { %v509_v45 = vadd.f32 %v810_v43, %v508_v44 }
 0x243   :  { %v512_v46 = vmax.f32 %v509_v45, 0.0 }
 0x245   :  { %v513_v47 = vpack.c.bf16 %v512_v46, %v512_v46 }
 0x247   :  { %755 = vmatmul.msk.bf16.vlgmr.msrb.gmra.mxu2 %vm534_vm1, %v513_v47 }
 0x248   :  { %v510_v48 = vpop.f32.mrf.mxu1 }
 0x2ca   :  { %v547_v50 = vpop.f32.mrf.mxu2 }
 0x2cb   :  { %v548_v51 = vadd.f32 %v811_v49, %v547_v50 }
 0x2cd   :  { %551 = vst [vmem:[#allocation8] sm:$0xff] %v548_v51 }
 0x2ce   :  { %562 = dma.vmem_to_hbm [thread:$0]  %s558_s18, 128, %s560_s21, [#allocation4]  }
 0x2d2   :  { %v549_v52 = vpop.f32.mrf.mxu2 }
 0x2d3   :  { %912 = dma.done.wait [#allocation4], 128  }
 0x2d4   :  { %913 = vsyncadd [#allocation4], 4294967168 }
 0x2d5   :  { %567 = vsyncpa [#allocation3], 1 }
 0x2d6   :  { %568 = vsyncpa [#allocation6], 1 }
 0x2d7   :  { %569 = vsyncpa [#allocation4], 1 }

</bundles_post_ra>
